<compile_context>
chip_gen: v6e
topology: v6e:2x2x1
jax: 0.10.0
libtpu: 0.0.40
codegen_flags: <defaults>
</compile_context>

<pallas_src>
import functools

import jax
import jax.numpy as jnp
from jax.experimental import pallas as pl
from jax.experimental.pallas import tpu as pltpu

LANE = 128        # lane width: feature dims padded to multiples of 128 (dense vst)
MAX_TILE_B = 512  # max rows per grid step


def _round_up(x, m):
    return (x + m - 1) // m * m


def _choose_tile_b(batch):
    """Rows per grid step: big (<=512) to amortize per-step overhead, but aim
    for >= 2 grid steps so v7x's two TensorCores both get work."""
    half = -(-batch // 2)                      # cdiv(batch, 2)
    tile = min(MAX_TILE_B, _round_up(half, 8))  # sublane-aligned
    return max(tile, 8)


def decoder_kernel(x_ref, w1_ref, b1_ref, w2_ref, b2_ref, w3_ref, b3_ref, o_ref):
    """Fused 3-layer MLP on one (tile_b, obs_dim) row tile.

    MXU matmuls run in bf16 with f32 accumulation; the bias/ReLU epilogue stays
    f32 on the VPU (portable to v5e). Dropout(p=0.4) in eval mode == identity.
    """
    x = x_ref[...].astype(jnp.bfloat16)        # cast in-kernel (no extra HBM pass)

    # Layer 1: Linear(obs -> hidden) + ReLU
    h1 = jnp.dot(x, w1_ref[...], preferred_element_type=jnp.float32)
    h1 = jnp.maximum(h1 + b1_ref[...], 0.0)

    # Layer 2: Linear(hidden -> hidden) + ReLU
    h2 = jnp.dot(h1.astype(jnp.bfloat16), w2_ref[...],
                 preferred_element_type=jnp.float32)
    h2 = jnp.maximum(h2 + b2_ref[...], 0.0)

    # Layer 3: Linear(hidden -> raw_obs)
    out = jnp.dot(h2.astype(jnp.bfloat16), w3_ref[...],
                  preferred_element_type=jnp.float32)
    o_ref[...] = (out + b3_ref[...]).astype(o_ref.dtype)


def prepare_decoder_params(params):
    """One-time pad + cast of Decoder weights (run OUTSIDE the hot loop).

    Weights are lane-padded to multiples of 128 and cast to bf16 for the MXU;
    biases stay f32 for the VPU epilogue. Zero padding is exact through
    matmul + bias + ReLU (padded columns stay exactly 0 at every layer).
    The x-contraction dim of w1 is left at its natural size (obs_dim) so the
    activations need no feature padding at all.
    """
    w1, b1 = params["w1"], params["b1"]
    w2, b2 = params["w2"], params["b2"]
    w3, b3 = params["w3"], params["b3"]
    obs_dim, hid = w1.shape
    raw = w3.shape[1]
    hid_p = _round_up(hid, LANE)
    raw_p = _round_up(raw, LANE)

    pad2 = lambda a, r, c: jnp.pad(a, ((0, r - a.shape[0]), (0, c - a.shape[1])))
    return {
        "w1": pad2(w1, obs_dim, hid_p).astype(jnp.bfloat16),
        "b1": pad2(b1, 1, hid_p),
        "w2": pad2(w2, hid_p, hid_p).astype(jnp.bfloat16),
        "b2": pad2(b2, 1, hid_p),
        "w3": pad2(w3, hid_p, raw_p).astype(jnp.bfloat16),
        "b3": pad2(b3, 1, raw_p),
        "obs_dim": obs_dim,
        "hidden_dim": hid,
        "raw_obs_dim": raw,
    }


@functools.partial(jax.jit, static_argnames=("hid_dim", "raw_dim"))
def _decoder_forward_padded(obs, w1p, b1p, w2p, b2p, w3p, b3p, *, hid_dim, raw_dim):
    """Returns the padded (b_p, raw_p) output slab (f32)."""
    B, obs_dim = obs.shape
    hid_p = w1p.shape[1]
    raw_p = w3p.shape[1]

    tile_b = _choose_tile_b(B)
    b_p = _round_up(B, tile_b)
    n_tiles = b_p // tile_b

    # Row-pad only (no feature padding, no dtype cast here).
    x = obs if b_p == B else jnp.pad(obs, ((0, b_p - B), (0, 0)))

    # Weights / biases: constant index_map -> fetched once, VMEM-resident
    # across every grid step.
    resident = lambda shape: pl.BlockSpec(shape, lambda i: (0, 0))

    # Advisory cost estimate on TRUE (unpadded) dims.
    flops = 2 * B * (obs_dim * hid_dim + hid_dim * hid_dim + hid_dim * raw_dim)
    bytes_accessed = (
        B * obs_dim * 4                                                   # x read (f32)
        + (obs_dim * hid_dim + hid_dim * hid_dim + hid_dim * raw_dim) * 2  # bf16 weights
        + (2 * hid_dim + raw_dim) * 4                                      # f32 biases
        + B * raw_dim * 4                                                  # output write
    )

    out_p = pl.pallas_call(
        decoder_kernel,
        out_shape=jax.ShapeDtypeStruct((b_p, raw_p), jnp.float32),
        grid=(n_tiles,),
        in_specs=[
            # Activations: tiled over rows, natural feature width (== full dim).
            pl.BlockSpec((tile_b, obs_dim), lambda i: (i, 0)),
            resident((obs_dim, hid_p)),
            resident((1, hid_p)),
            resident((hid_p, hid_p)),
            resident((1, hid_p)),
            resident((hid_p, raw_p)),
            resident((1, raw_p)),
        ],
        out_specs=pl.BlockSpec((tile_b, raw_p), lambda i: (i, 0)),  # lane-dense stores
        compiler_params=pltpu.CompilerParams(
            dimension_semantics=("parallel",),   # shard row tiles across TCs on v7x
            vmem_limit_bytes=32 * 1024 * 1024,
        ),
        cost_estimate=pl.CostEstimate(
            flops=flops, transcendentals=0, bytes_accessed=bytes_accessed),
    )(x, w1p, b1p, w2p, b2p, w3p, b3p)
    return out_p


def decoder_forward_padded(obs, prepared):
    return _decoder_forward_padded(
        obs, prepared["w1"], prepared["b1"], prepared["w2"], prepared["b2"],
        prepared["w3"], prepared["b3"],
        hid_dim=prepared["hidden_dim"], raw_dim=prepared["raw_obs_dim"])


def decoder_forward(obs, prepared):
    """Module-equivalent forward: (B, obs_dim) f32 -> (B, raw_obs_dim) f32.

    The trailing slice is kept out of the pallas_call; consumers that can read
    the padded slab should call decoder_forward_padded() directly.
    """
    out_p = decoder_forward_padded(obs, prepared)
    return out_p[: obs.shape[0], : prepared["raw_obs_dim"]]


def init_decoder_params(key, obs_dim, raw_obs_dim, hidden_dim=None):
    """Synthetic init matching nn.Linear shapes (weights pre-transposed to (in, out))."""
    hidden_dim = hidden_dim if hidden_dim is not None else 2 * obs_dim
    k = jax.random.split(key, 6)
    s1 = 1.0 / jnp.sqrt(obs_dim)
    s2 = 1.0 / jnp.sqrt(hidden_dim)
    return {
        "w1": jax.random.uniform(k[0], (obs_dim, hidden_dim), jnp.float32, -s1, s1),
        "b1": jax.random.uniform(k[1], (1, hidden_dim), jnp.float32, -s1, s1),
        "w2": jax.random.uniform(k[2], (hidden_dim, hidden_dim), jnp.float32, -s2, s2),
        "b2": jax.random.uniform(k[3], (1, hidden_dim), jnp.float32, -s2, s2),
        "w3": jax.random.uniform(k[4], (hidden_dim, raw_obs_dim), jnp.float32, -s2, s2),
        "b3": jax.random.uniform(k[5], (1, raw_obs_dim), jnp.float32, -s2, s2),
    }


def decoder_reference(obs, params):
    """Precision-matched reference: bf16 MXU inputs, f32 accumulation, f32 epilogue."""
    bf = jnp.bfloat16
    h1 = jnp.maximum(
        jnp.dot(obs.astype(bf), params["w1"].astype(bf),
                preferred_element_type=jnp.float32) + params["b1"], 0.0)
    h2 = jnp.maximum(
        jnp.dot(h1.astype(bf), params["w2"].astype(bf),
                preferred_element_type=jnp.float32) + params["b2"], 0.0)
    return (jnp.dot(h2.astype(bf), params["w3"].astype(bf),
                    preferred_element_type=jnp.float32) + params["b3"])


if __name__ == "__main__":
    key = jax.random.PRNGKey(0)
    k_params, k_x = jax.random.split(key)

    batch = 256          # -> 2 grid steps of 128 rows (both v7x TCs busy)
    obs_dim = 16         # Decoder input: latent obs
    raw_obs_dim = 24     # Decoder output: raw observation reconstruction
    hidden_dim = 2 * obs_dim

    params = init_decoder_params(k_params, obs_dim, raw_obs_dim, hidden_dim)
    prepared = prepare_decoder_params(params)   # one-time pad + bf16 cast
    obs = jax.random.normal(k_x, (batch, obs_dim), jnp.float32)

    out = jax.block_until_ready(decoder_forward(obs, prepared))
    ref = decoder_reference(obs, params)

    assert out.shape == (batch, raw_obs_dim)
    assert jnp.allclose(out, ref, atol=1e-3, rtol=1e-3), "Pallas output mismatch vs reference"

    print("KERNEL_OK")
</pallas_src>

<mosaic_0001>
module attributes {stable_mosaic.version = 11 : i64} {
  func.func @decoder_kernel(%arg0: i32, %arg1: memref<128x16xf32, #tpu.memory_space<vmem>>, %arg2: memref<16x128xbf16, #tpu.memory_space<vmem>>, %arg3: memref<1x128xf32, #tpu.memory_space<vmem>>, %arg4: memref<128x128xbf16, #tpu.memory_space<vmem>>, %arg5: memref<1x128xf32, #tpu.memory_space<vmem>>, %arg6: memref<128x128xbf16, #tpu.memory_space<vmem>>, %arg7: memref<1x128xf32, #tpu.memory_space<vmem>>, %arg8: memref<128x128xf32, #tpu.memory_space<vmem>>) attributes {dimension_semantics = [#tpu.dimension_semantics<parallel>], iteration_bounds = array<i64: 2>, scalar_prefetch = 0 : i64, scratch_operands = 0 : i64, tpu.core_type = #tpu.core_type<tc>, window_params = [{transform_indices = @transform_0, window_bounds = array<i64: 128, 16>}, {pipeline_mode = #tpu.pipeline_mode<synchronous>, transform_indices = @transform_1, window_bounds = array<i64: 16, 128>}, {pipeline_mode = #tpu.pipeline_mode<synchronous>, transform_indices = @transform_2, window_bounds = array<i64: 1, 128>}, {pipeline_mode = #tpu.pipeline_mode<synchronous>, transform_indices = @transform_3, window_bounds = array<i64: 128, 128>}, {pipeline_mode = #tpu.pipeline_mode<synchronous>, transform_indices = @transform_4, window_bounds = array<i64: 1, 128>}, {pipeline_mode = #tpu.pipeline_mode<synchronous>, transform_indices = @transform_5, window_bounds = array<i64: 128, 128>}, {pipeline_mode = #tpu.pipeline_mode<synchronous>, transform_indices = @transform_6, window_bounds = array<i64: 1, 128>}, {transform_indices = @transform_7, window_bounds = array<i64: 128, 128>}]} {
    %c0 = arith.constant 0 : index
    %c0_0 = arith.constant 0 : index
    %0 = vector.load %arg1[%c0, %c0_0] : memref<128x16xf32, #tpu.memory_space<vmem>>, vector<128x16xf32>
    %1 = arith.truncf %0 : vector<128x16xf32> to vector<128x16xbf16>
    %c0_1 = arith.constant 0 : index
    %c0_2 = arith.constant 0 : index
    %2 = vector.load %arg2[%c0_1, %c0_2] : memref<16x128xbf16, #tpu.memory_space<vmem>>, vector<16x128xbf16>
    %cst = arith.constant dense<0.000000e+00> : vector<128x128xf32>
    %3 = tpu.matmul %1, %2, %cst {dimension_numbers = #tpu.dot_dimension_numbers<[1], [0], [0], [1], [0, 0, 1, 1], [], []>} : vector<128x16xbf16>, vector<16x128xbf16>, vector<128x128xf32> -> vector<128x128xf32>
    %c0_3 = arith.constant 0 : index
    %c0_4 = arith.constant 0 : index
    %4 = vector.load %arg3[%c0_3, %c0_4] : memref<1x128xf32, #tpu.memory_space<vmem>>, vector<1x128xf32>
    %5 = vector.broadcast %4 : vector<1x128xf32> to vector<128x128xf32>
    %6 = arith.addf %3, %5 : vector<128x128xf32>
    %cst_5 = arith.constant 0.000000e+00 : f32
    %7 = vector.broadcast %cst_5 : f32 to vector<128x128xf32>
    %8 = arith.maximumf %6, %7 : vector<128x128xf32>
    %9 = arith.truncf %8 : vector<128x128xf32> to vector<128x128xbf16>
    %c0_6 = arith.constant 0 : index
    %c0_7 = arith.constant 0 : index
    %10 = vector.load %arg4[%c0_6, %c0_7] : memref<128x128xbf16, #tpu.memory_space<vmem>>, vector<128x128xbf16>
    %cst_8 = arith.constant dense<0.000000e+00> : vector<128x128xf32>
    %11 = tpu.matmul %9, %10, %cst_8 {dimension_numbers = #tpu.dot_dimension_numbers<[1], [0], [0], [1], [0, 0, 1, 1], [], []>} : vector<128x128xbf16>, vector<128x128xbf16>, vector<128x128xf32> -> vector<128x128xf32>
    %c0_9 = arith.constant 0 : index
    %c0_10 = arith.constant 0 : index
    %12 = vector.load %arg5[%c0_9, %c0_10] : memref<1x128xf32, #tpu.memory_space<vmem>>, vector<1x128xf32>
    %13 = vector.broadcast %12 : vector<1x128xf32> to vector<128x128xf32>
    %14 = arith.addf %11, %13 : vector<128x128xf32>
    %cst_11 = arith.constant 0.000000e+00 : f32
    %15 = vector.broadcast %cst_11 : f32 to vector<128x128xf32>
    %16 = arith.maximumf %14, %15 : vector<128x128xf32>
    %17 = arith.truncf %16 : vector<128x128xf32> to vector<128x128xbf16>
    %c0_12 = arith.constant 0 : index
    %c0_13 = arith.constant 0 : index
    %18 = vector.load %arg6[%c0_12, %c0_13] : memref<128x128xbf16, #tpu.memory_space<vmem>>, vector<128x128xbf16>
    %cst_14 = arith.constant dense<0.000000e+00> : vector<128x128xf32>
    %19 = tpu.matmul %17, %18, %cst_14 {dimension_numbers = #tpu.dot_dimension_numbers<[1], [0], [0], [1], [0, 0, 1, 1], [], []>} : vector<128x128xbf16>, vector<128x128xbf16>, vector<128x128xf32> -> vector<128x128xf32>
    %c0_15 = arith.constant 0 : index
    %c0_16 = arith.constant 0 : index
    %20 = vector.load %arg7[%c0_15, %c0_16] : memref<1x128xf32, #tpu.memory_space<vmem>>, vector<1x128xf32>
    %21 = vector.broadcast %20 : vector<1x128xf32> to vector<128x128xf32>
    %22 = arith.addf %19, %21 : vector<128x128xf32>
    %c0_17 = arith.constant 0 : index
    %c0_18 = arith.constant 0 : index
    %23 = vector.load %arg8[%c0_17, %c0_18] : memref<128x128xf32, #tpu.memory_space<vmem>>, vector<128x128xf32>
    tpu.vector_store %arg8[%c0_17, %c0_18], %22 {strides = array<i32>} : memref<128x128xf32, #tpu.memory_space<vmem>>, vector<128x128xf32>,
    return
  }
  func.func @transform_0(%arg0: i32) -> (i32, i32) {
    %c0_i32 = arith.constant 0 : i32
    %c0_i32_0 = arith.constant 0 : i32
    return %arg0, %c0_i32 : i32, i32
  }
  func.func @transform_1(%arg0: i32) -> (i32, i32) {
    %c0_i32 = arith.constant 0 : i32
    %c0_i32_0 = arith.constant 0 : i32
    %c0_i32_1 = arith.constant 0 : i32
    return %c0_i32, %c0_i32_0 : i32, i32
  }
  func.func @transform_2(%arg0: i32) -> (i32, i32) {
    %c0_i32 = arith.constant 0 : i32
    %c0_i32_0 = arith.constant 0 : i32
    %c0_i32_1 = arith.constant 0 : i32
    return %c0_i32, %c0_i32_0 : i32, i32
  }
  func.func @transform_3(%arg0: i32) -> (i32, i32) {
    %c0_i32 = arith.constant 0 : i32
    %c0_i32_0 = arith.constant 0 : i32
    %c0_i32_1 = arith.constant 0 : i32
    return %c0_i32, %c0_i32_0 : i32, i32
  }
  func.func @transform_4(%arg0: i32) -> (i32, i32) {
    %c0_i32 = arith.constant 0 : i32
    %c0_i32_0 = arith.constant 0 : i32
    %c0_i32_1 = arith.constant 0 : i32
    return %c0_i32, %c0_i32_0 : i32, i32
  }
  func.func @transform_5(%arg0: i32) -> (i32, i32) {
    %c0_i32 = arith.constant 0 : i32
    %c0_i32_0 = arith.constant 0 : i32
    %c0_i32_1 = arith.constant 0 : i32
    return %c0_i32, %c0_i32_0 : i32, i32
  }
  func.func @transform_6(%arg0: i32) -> (i32, i32) {
    %c0_i32 = arith.constant 0 : i32
    %c0_i32_0 = arith.constant 0 : i32
    %c0_i32_1 = arith.constant 0 : i32
    return %c0_i32, %c0_i32_0 : i32, i32
  }
  func.func @transform_7(%arg0: i32) -> (i32, i32) {
    %c0_i32 = arith.constant 0 : i32
    %c0_i32_0 = arith.constant 0 : i32
    return %arg0, %c0_i32 : i32, i32
  }
}

</mosaic_0001>

<bundles_post_ra>
// kernel: _decoder_forward_padded.1
= control target key start
LH: loop header
LB: loop body
LE: loop exit
PB: predicated region body
PF: predicated region fallthrough
CT: control target
= control target key end

     0   :  { %12 = vsyncpa [#allocation3], 0  ;;  %s1455_s0 = inlined_call_operand.vmem [shape: f32[256,16], index: 0, kind: input, shape index: {}]   ;;  %s1456_s1 = inlined_call_operand.vmem [shape: bf16[16,128], index: 1, kind: input, shape index: {}]   ;;  %s1457_s2 = inlined_call_operand.vmem [shape: f32[1,128], index: 2, kind: input, shape index: {}]   ;;  %s1458_s3 = inlined_call_operand.vmem [shape: bf16[128,128], index: 3, kind: input, shape index: {}]   ;;  %s1459_s4 = inlined_call_operand.vmem [shape: f32[1,128], index: 4, kind: input, shape index: {}]   ;;  %s1460_s5 = inlined_call_operand.vmem [shape: bf16[128,128], index: 5, kind: input, shape index: {}]   ;;  %s1461_s6 = inlined_call_operand.vmem [shape: f32[1,128], index: 6, kind: input, shape index: {}]   ;;  %s1462_s7 = inlined_call_operand.hbm [shape: f32[256,128], index: 7, kind: output, shape index: {}]  }
   0x1   :  { %14 = vsyncpa [#allocation3 + $0x1], 0  ;;  %s1245_s24 = smov 0   ;;  %s1247_s25 = smov 0  }
   0x2   :  { %s1249_s26 = smov 0   ;;  %s1251_s27 = smov 0  }
   0x3 LB: > { %s1266_s28 = sadd.s32 4294967295, %s1200_s27   ;;  %s918_s29 = sadd.s32 4294967294, %s1200_s27   ;;  %s1200_s27 = sphi %s1251_s27, %s1468_s27   ;;  %s1196_s26 = sphi %s1249_s26, %s1467_s26   ;;  %s1192_s25 = sphi %s1247_s25, %s1466_s25   ;;  %s1188_s24 = sphi %s1245_s24, %s1465_s24  }
   0x4   : > { %s1270_s30 = sadd.s32 1, %s1200_s27   ;;  %s179_s8 = sadd.s32 1, %s1196_s26 }
   0x5   : > { %s176_s9 = ssub.s32 %s1200_s27, %s1270_s30  ;;  %p189_p0 = scmp.ne.s32.totalorder %s1196_s26, %s1192_s25 }
   0x6   : > { %p177_p1 = scmp.eq.s32.totalorder %s176_s9, 0  ;;  %p190_p2 = scmp.eq.s32.totalorder %s1266_s28, 1 }
   0x7   : > { %p195_p3 = scmp.ne.s32.totalorder %s1192_s25, %s1188_s24  ;;  %p196_p4 = scmp.eq.s32.totalorder %s918_s29, 1 }
   0x8   : > { %s1281_s10 = scalar_select %p177_p1, %s1196_s26, %s179_s8  }
   0x9   : > { %p1283_p5 = por %p190_p2, %p189_p0  ;;  %p1287_p6 = por %p196_p4, %p195_p3 }
   0xa   : > { %p921_p7 = scmp.ge.s32.totalorder %s1200_s27, 1  ;;  %p241_p8 = scmp.lt.s32.totalorder %s1200_s27, 3 }
   0xc   : > { %p242_p9 = pnand %p921_p7, %p241_p8 }
   0xd   : > { %s923_s15 = sshll.u32 (!%p242_p9), %s1266_s28, 4  ;;  %s270_s14 = sand.u32 (!%p242_p9), 1, %s1192_s25  }
   0xe   : > { %245 = sbr.rel (%p242_p9) target bundleno = 677 (0x2a5), region = 48  ;;  %p274_p10 = scmp.lt.s32.totalorder (!%p242_p9), %s923_s15, 31 }
   0xf   : > { %s958_s19 = sshll.u32 (!%p242_p9), %s1266_s28, 11  ;;  %s1415_s28 = scalar_lea.sflag (!%p242_p9), [#allocation3], %s270_s14 }
  0x10   : > { %s1202_s8 = smov (!%p242_p9), [#allocation2]  }
  0x11   : > { %s1144_s9 = sshll.u32 (!%p242_p9), %s1202_s8, 4  ;;  %s1145_s9 = int_to_ptr.vmem [resolvable:$false] %s1144_s9 }
  0x12   : > { %s1146_s13 = scalar_lea.vmem (!%p242_p9), %s1145_s9, 4096 }
  0x13   : > { %v1123_v0 = vld [vmem:[%s1456_s1] sm:$0xff]   ;;  %v1124_v1 = vld [vmem:[%s1458_s3 + $0x38] sm:$0xff]   ;;  %s1470_s15 = smov (!%p274_p10, %s923_s15), 31  ;;  %v1125_v2 = vld [vmem:[%s1458_s3 + $0x30] sm:$0xff]   ;;  %vm320_vm0 = vcmask 130048  }
  0x14   : > { %1000 = vmatprep.subr.bf16.mxu0 %v1123_v0  ;;  %1018 = vmatprep.subr.bf16.mxu1 %v1124_v1  ;;  %s924_s20 = sshll.u32 %s1470_s15, 3  ;;  %v1126_v3 = vld [vmem:[%s1458_s3 + $0x28] sm:$0xff]   ;;  %v1127_v13 = vld [vmem:[%s1458_s3 + $0x20] sm:$0xff]   ;;  %v1128_v18 = vld [vmem:[%s1458_s3 + $0x18] sm:$0xff]   ;;  %s922_s15 = sshll.u32 %s270_s14, 7 }
  0x15   : > { %1001 = vmatpush3.bf16.msra.mxu0 %v1123_v0  ;;  %1019 = vmatpush3.bf16.msra.mxu1 %v1124_v1  ;;  %s1306_s23 = scalar_lea.vmem %s1455_s0, %s924_s20  ;;  %v1129_v30 = vld [vmem:[%s1458_s3 + $0x10] sm:$0xff]   ;;  %v1130_v31 = vld [vmem:[%s1458_s3 + $0x8] sm:$0xff]   ;;  %v1131_v32 = vld [vmem:[%s1458_s3] sm:$0xff]   ;;  %s1386_s18 = scalar_lea.vmem [#allocation2], %s922_s15 }
  0x16   : > { %1020 = vmatprep.subr.bf16.mxu1 %v1125_v2  ;;  %v281_v4 = vld [vmem:[%s1306_s23] sm:$0xff]  ;;  %v282_v5 = vld [vmem:[%s1306_s23 + $0x8] sm:$0xff]  ;;  %v283_v6 = vld [vmem:[%s1306_s23 + $0x10] sm:$0xff]  ;;  %s856_s20 = sshll.u32 %s1386_s18, 4  ;;  %s1409_s20 = int_to_ptr.vmem [resolvable:$true] %s856_s20 }
  0x17   : > { %v297_v7 = vpack.c.bf16 %v282_v5, %v281_v4  ;;  %v284_v8 = vld [vmem:[%s1306_s23 + $0x18] sm:$0xff]  ;;  %v285_v9 = vld [vmem:[%s1306_s23 + $0x20] sm:$0xff]  ;;  %v286_v10 = vld [vmem:[%s1306_s23 + $0x28] sm:$0xff]  ;;  %s1140_s29 = scalar_lea.vmem %s1409_s20, 2048  ;;  %p1147_p0 = scmp.lt.s32.totalorder %s1409_s20, %s1145_s9 }
  0x18   : > { %v298_v11 = vpack.c.bf16 %v284_v8, %v283_v6  ;;  %v299_v12 = vpack.c.bf16 %v286_v10, %v285_v9  ;;  %v287_v14 = vld [vmem:[%s1306_s23 + $0x30] sm:$0xff]  ;;  %v288_v15 = vld [vmem:[%s1306_s23 + $0x38] sm:$0xff]  ;;  %v289_v16 = vld [vmem:[%s1306_s23 + $0x40] sm:$0xff]  ;;  %p1141_p11 = scmp.ne.s32.totalorder %s1409_s20, %s1140_s29  ;;  %p1148_p1 = scmp.lt.s32.totalorder %s1146_s13, %s1140_s29 }
  0x19   : > { %1021 = vmatpush3.bf16.msra.mxu1 %v1125_v2  ;;  %1002 = vmatprep.mubr.msk.bf16.mxu0 %vm320_vm0, %v297_v7  ;;  %v290_v17 = vld [vmem:[%s1306_s23 + $0x48] sm:$0xff]  ;;  %v300_v19 = vpack.c.bf16 %v288_v15, %v287_v14  ;;  %v291_v21 = vld [vmem:[%s1306_s23 + $0x50] sm:$0xff]  ;;  %v292_v22 = vld [vmem:[%s1306_s23 + $0x58] sm:$0xff] }
  0x1a   : > { %1022 = vmatprep.subr.bf16.mxu1 %v1126_v3  ;;  %1003 = vmatmul.mubr.msk.bf16.vlgmr.msra.gmra.mxu0 %vm320_vm0, %v298_v11  ;;  %v301_v20 = vpack.c.bf16 %v290_v17, %v289_v16  ;;  %v293_v23 = vld [vmem:[%s1306_s23 + $0x60] sm:$0xff]  ;;  %v294_v24 = vld [vmem:[%s1306_s23 + $0x68] sm:$0xff]  ;;  %v302_v25 = vpack.c.bf16 %v292_v22, %v291_v21  ;;  %v295_v27 = vld [vmem:[%s1306_s23 + $0x70] sm:$0xff]  ;;  %p1142_p12 = pnand %p1141_p11, %p1283_p5  ;;  %p1149_p2 = por %p1148_p1, %p1147_p0 }
  0x1b   : > { %1006 = vmatprep.mubr.msk.bf16.mxu0 %vm320_vm0, %v299_v12  ;;  %v303_v26 = vpack.c.bf16 %v294_v24, %v293_v23  ;;  %v296_v28 = vld [vmem:[%s1306_s23 + $0x78] sm:$0xff]  ;;  %v1133_v34 = vld [vmem:[%s1460_s5 + $0x30] sm:$0xff]   ;;  %v1134_v35 = vld [vmem:[%s1460_s5 + $0x28] sm:$0xff]   ;;  %s1407_s23 = scalar_lea.hbm %s1462_s7, %s958_s19 }
  0x1c   : > { %v304_v29 = vpack.c.bf16 %v296_v28, %v295_v27  ;;  %v1132_v33 = vld [vmem:[%s1460_s5 + $0x38] sm:$0xff]   ;;  %v1135_v36 = vld [vmem:[%s1460_s5 + $0x20] sm:$0xff]   ;;  %p1143_p13 = pneg %p1142_p12 }
  0x1d   : > { %1023 = vmatpush3.bf16.msra.mxu1 %v1126_v3  ;;  %1050 = vmatprep.subr.bf16.mxu0 %v1132_v33  ;;  %v1136_v37 = vld [vmem:[%s1460_s5 + $0x18] sm:$0xff]   ;;  %v925_v40 = vld [vmem:[%s1457_s2] ss:$0 sm:$0xff] }
  0x1e   : > { %1024 = vmatprep.subr.bf16.mxu1 %v1127_v13  ;;  %1051 = vmatpush3.bf16.msra.mxu0 %v1132_v33  ;;  %v1139_v33 = vld [vmem:[%s1460_s5] sm:$0xff]   ;;  %p1150_p3 = pnand %p1149_p2, %p1143_p13 }
  0x1f   : > { %1052 = vmatprep.subr.bf16.mxu0 %v1133_v34 }
  0x21   : > { %1025 = vmatpush3.bf16.msra.mxu1 %v1127_v13 }
  0x22   : > { %1026 = vmatprep.subr.bf16.mxu1 %v1128_v18  ;;  %1007 = vmatmul.mubr.msk.bf16.gmra.mxu0 %vm320_vm0, %v300_v19 }
  0x23   : > { %1010 = vmatprep.mubr.msk.bf16.mxu0 %vm320_vm0, %v301_v20  ;;  %1053 = vmatpush3.bf16.msra.mxu0 %v1133_v34 }
  0x24   : > { %1054 = vmatprep.subr.bf16.mxu0 %v1134_v35 }
  0x25   : > { %1027 = vmatpush3.bf16.msra.mxu1 %v1128_v18 }
  0x26   : > { %1028 = vmatprep.subr.bf16.mxu1 %v1129_v30 }
  0x27   : > { %1055 = vmatpush3.bf16.msra.mxu0 %v1134_v35 }
  0x28   : > { %1056 = vmatprep.subr.bf16.mxu0 %v1135_v36 }
  0x29   : > { %1029 = vmatpush3.bf16.msra.mxu1 %v1129_v30 }
  0x2a   : > { %1011 = vmatmul.mubr.msk.bf16.gmra.mxu0 %vm320_vm0, %v302_v25  ;;  %1030 = vmatprep.subr.bf16.mxu1 %v1130_v31 }
  0x2b   : > { %1014 = vmatprep.mubr.msk.bf16.mxu0 %vm320_vm0, %v303_v26  ;;  %1057 = vmatpush3.bf16.msra.mxu0 %v1135_v36  ;;  %v935_v36 = vld [vmem:[%s1459_s4] ss:$0 sm:$0xff] }
  0x2c   : > { %1058 = vmatprep.subr.bf16.mxu0 %v1136_v37 }
  0x2d   : > { %1031 = vmatpush3.bf16.msra.mxu1 %v1130_v31  ;;  %v1137_v31 = vld [vmem:[%s1460_s5 + $0x10] sm:$0xff]  }
  0x2e   : > { %1032 = vmatprep.subr.bf16.mxu1 %v1131_v32 }
  0x2f   : > { %1059 = vmatpush3.bf16.msra.mxu0 %v1136_v37 }
  0x30   : > { %1060 = vmatprep.subr.bf16.mxu0 %v1137_v31 }
  0x31   : > { %1033 = vmatpush3.bf16.msra.mxu1 %v1131_v32  ;;  %v1138_v32 = vld [vmem:[%s1460_s5 + $0x8] sm:$0xff]  }
  0x32   : > { %1015 = vmatmul.mubr.msk.bf16.gmra.mxu0 %vm320_vm0, %v304_v29 }
  0x33   : > { %1061 = vmatpush3.bf16.msra.mxu0 %v1137_v31 }
  0x34   : > { %1062 = vmatprep.subr.bf16.mxu0 %v1138_v32 }
  0x37   : > { %1063 = vmatpush3.bf16.msra.mxu0 %v1138_v32 }
  0x38   : > { %1064 = vmatprep.subr.bf16.mxu0 %v1139_v33 }
  0x3b   : > { %1065 = vmatpush3.bf16.msra.mxu0 %v1139_v33 }
  0xda   : > { %v1004_v38 = vpop.f32.mrf.mxu0 }
  0xdb   : > { %v388_v44 = vadd.f32 %v1004_v38, %v925_v40 }
  0xdc   : > { %v379_v39 = vpop.f32.mrf.mxu0 }
  0xdd   : > { %v380_v42 = vadd.f32 %v925_v40, %v379_v39  ;;  %v444_v51 = vmax.f32 %v388_v44, 0.0 }
  0xde   : > { %v1005_v41 = vpop.f32.mrf.mxu0 }
  0xdf   : > { %v391_v43 = vadd.f32 %v1005_v41, %v925_v40  ;;  %v442_v49 = vmax.f32 %v380_v42, 0.0 }
  0xe0   : > { %v382_v45 = vpop.f32.mrf.mxu0 }
  0xe1   : > { %v383_v46 = vadd.f32 %v925_v40, %v382_v45  ;;  %v445_v47 = vmax.f32 %v391_v43, 0.0 }
  0xe2   : > { %v1008_v48 = vpop.f32.mrf.mxu0 }
  0xe3   : > { %v443_v50 = vmax.f32 %v383_v46, 0.0  ;;  %v459_v54 = vpack.c.bf16 %v445_v47, %v444_v51  ;;  %v404_v58 = vadd.f32 %v1008_v48, %v925_v40 }
  0xe4   : > { %v395_v52 = vpop.f32.mrf.mxu0 }
  0xe5   : > { %v458_v53 = vpack.c.bf16 %v443_v50, %v442_v49  ;;  %v396_v56 = vadd.f32 %v925_v40, %v395_v52  ;;  %v448_v1 = vmax.f32 %v404_v58, 0.0 }
  0xe6   : > { %v1009_v55 = vpop.f32.mrf.mxu0 }
  0xe7   : > { %v407_v57 = vadd.f32 %v1009_v55, %v925_v40  ;;  %1034 = vmatprep.mubr.bf16.mxu1 %v458_v53  ;;  %v446_v63 = vmax.f32 %v396_v56, 0.0 }
  0xe8   : > { %v398_v59 = vpop.f32.mrf.mxu0  ;;  %1035 = vmatmul.mubr.bf16.vlgmr.msra.gmra.mxu1 %v459_v54 }
  0xe9   : > { %v399_v60 = vadd.f32 %v925_v40, %v398_v59  ;;  %v449_v61 = vmax.f32 %v407_v57, 0.0 }
  0xea   : > { %v1012_v62 = vpop.f32.mrf.mxu0 }
  0xeb   : > { %v447_v0 = vmax.f32 %v399_v60, 0.0  ;;  %v461_v4 = vpack.c.bf16 %v449_v61, %v448_v1  ;;  %v420_v8 = vadd.f32 %v1012_v62, %v925_v40 }
  0xec   : > { %v411_v2 = vpop.f32.mrf.mxu0 }
  0xed   : > { %v460_v3 = vpack.c.bf16 %v447_v0, %v446_v63  ;;  %v412_v6 = vadd.f32 %v925_v40, %v411_v2  ;;  %v452_v15 = vmax.f32 %v420_v8, 0.0 }
  0xee   : > { %v1013_v5 = vpop.f32.mrf.mxu0 }
  0xef   : > { %v423_v7 = vadd.f32 %v1013_v5, %v925_v40  ;;  %1038 = vmatprep.mubr.bf16.mxu1 %v460_v3  ;;  %v450_v13 = vmax.f32 %v412_v6, 0.0 }
  0xf0   : > { %v414_v9 = vpop.f32.mrf.mxu0  ;;  %1039 = vmatmul.mubr.bf16.gmra.mxu1 %v461_v4 }
  0xf1   : > { %v415_v10 = vadd.f32 %v925_v40, %v414_v9  ;;  %v453_v11 = vmax.f32 %v423_v7, 0.0 }
  0xf2   : > { %v1016_v12 = vpop.f32.mrf.mxu0 }
  0xf3   : > { %v451_v14 = vmax.f32 %v415_v10, 0.0  ;;  %v463_v18 = vpack.c.bf16 %v453_v11, %v452_v15  ;;  %v436_v22 = vadd.f32 %v1016_v12, %v925_v40 }
  0xf4   : > { %v427_v16 = vpop.f32.mrf.mxu0 }
  0xf5   : > { %v462_v17 = vpack.c.bf16 %v451_v14, %v450_v13  ;;  %v428_v20 = vadd.f32 %v925_v40, %v427_v16  ;;  %v456_v28 = vmax.f32 %v436_v22, 0.0 }
  0xf6   : > { %v1017_v19 = vpop.f32.mrf.mxu0 }
  0xf7   : > { %v439_v21 = vadd.f32 %v1017_v19, %v925_v40  ;;  %1042 = vmatprep.mubr.bf16.mxu1 %v462_v17  ;;  %v454_v26 = vmax.f32 %v428_v20, 0.0 }
  0xf8   : > { %v430_v23 = vpop.f32.mrf.mxu0  ;;  %1043 = vmatmul.mubr.bf16.gmra.mxu1 %v463_v18 }
  0xf9   : > { %v431_v24 = vadd.f32 %v925_v40, %v430_v23  ;;  %v457_v25 = vmax.f32 %v439_v21, 0.0 }
  0xfb   : > { %v455_v27 = vmax.f32 %v431_v24, 0.0  ;;  %v465_v30 = vpack.c.bf16 %v457_v25, %v456_v28 }
  0xfd   : > { %v464_v29 = vpack.c.bf16 %v455_v27, %v454_v26  ;;  %v944_v27 = vld [vmem:[%s1461_s6] ss:$0 sm:$0xff] }
  0xff   : > { %1046 = vmatprep.mubr.bf16.mxu1 %v464_v29 }
 0x100   : > { %1047 = vmatmul.mubr.bf16.gmra.mxu1 %v465_v30 }
 0x1a8   : > { %v1036_v34 = vpop.f32.mrf.mxu1 }
 0x1a9   : > { %v580_v40 = vadd.f32 %v1036_v34, %v935_v36 }
 0x1aa   : > { %v571_v35 = vpop.f32.mrf.mxu1 }
 0x1ab   : > { %v572_v38 = vadd.f32 %v935_v36, %v571_v35  ;;  %v636_v47 = vmax.f32 %v580_v40, 0.0 }
 0x1ac   : > { %v1037_v37 = vpop.f32.mrf.mxu1 }
 0x1ad   : > { %v583_v39 = vadd.f32 %v1037_v37, %v935_v36  ;;  %v634_v45 = vmax.f32 %v572_v38, 0.0 }
 0x1ae   : > { %v574_v41 = vpop.f32.mrf.mxu1 }
 0x1af   : > { %v575_v42 = vadd.f32 %v935_v36, %v574_v41  ;;  %v637_v43 = vmax.f32 %v583_v39, 0.0 }
 0x1b0   : > { %v1040_v44 = vpop.f32.mrf.mxu1 }
 0x1b1   : > { %v635_v46 = vmax.f32 %v575_v42, 0.0  ;;  %v651_v50 = vpack.c.bf16 %v637_v43, %v636_v47  ;;  %v596_v54 = vadd.f32 %v1040_v44, %v935_v36 }
 0x1b2   : > { %v587_v48 = vpop.f32.mrf.mxu1 }
 0x1b3   : > { %v650_v49 = vpack.c.bf16 %v635_v46, %v634_v45  ;;  %v588_v52 = vadd.f32 %v935_v36, %v587_v48  ;;  %v640_v61 = vmax.f32 %v596_v54, 0.0 }
 0x1b4   : > { %v1041_v51 = vpop.f32.mrf.mxu1 }
 0x1b5   : > { %v599_v53 = vadd.f32 %v1041_v51, %v935_v36  ;;  %1066 = vmatprep.mubr.bf16.mxu0 %v650_v49  ;;  %v638_v59 = vmax.f32 %v588_v52, 0.0 }
 0x1b6   : > { %v590_v55 = vpop.f32.mrf.mxu1  ;;  %1067 = vmatmul.mubr.bf16.vlgmr.msra.gmra.mxu0 %v651_v50 }
 0x1b7   : > { %v591_v56 = vadd.f32 %v935_v36, %v590_v55  ;;  %v641_v57 = vmax.f32 %v599_v53, 0.0 }
 0x1b8   : > { %v1044_v58 = vpop.f32.mrf.mxu1 }
 0x1b9   : > { %v639_v60 = vmax.f32 %v591_v56, 0.0  ;;  %v653_v0 = vpack.c.bf16 %v641_v57, %v640_v61  ;;  %v612_v4 = vadd.f32 %v1044_v58, %v935_v36 }
 0x1ba   : > { %v603_v62 = vpop.f32.mrf.mxu1 }
 0x1bb   : > { %v652_v63 = vpack.c.bf16 %v639_v60, %v638_v59  ;;  %v604_v2 = vadd.f32 %v935_v36, %v603_v62  ;;  %v644_v11 = vmax.f32 %v612_v4, 0.0 }
 0x1bc   : > { %v1045_v1 = vpop.f32.mrf.mxu1 }
 0x1bd   : > { %v615_v3 = vadd.f32 %v1045_v1, %v935_v36  ;;  %1070 = vmatprep.mubr.bf16.mxu0 %v652_v63  ;;  %v642_v9 = vmax.f32 %v604_v2, 0.0 }
 0x1be   : > { %v606_v5 = vpop.f32.mrf.mxu1  ;;  %1071 = vmatmul.mubr.bf16.gmra.mxu0 %v653_v0 }
 0x1bf   : > { %v607_v6 = vadd.f32 %v935_v36, %v606_v5  ;;  %v645_v7 = vmax.f32 %v615_v3, 0.0 }
 0x1c0   : > { %v1048_v8 = vpop.f32.mrf.mxu1 }
 0x1c1   : > { %v643_v10 = vmax.f32 %v607_v6, 0.0  ;;  %v655_v14 = vpack.c.bf16 %v645_v7, %v644_v11  ;;  %v628_v18 = vadd.f32 %v1048_v8, %v935_v36 }
 0x1c2   : > { %v619_v12 = vpop.f32.mrf.mxu1 }
 0x1c3   : > { %v654_v13 = vpack.c.bf16 %v643_v10, %v642_v9  ;;  %v620_v16 = vadd.f32 %v935_v36, %v619_v12  ;;  %v648_v24 = vmax.f32 %v628_v18, 0.0 }
 0x1c4   : > { %v1049_v15 = vpop.f32.mrf.mxu1 }
 0x1c5   : > { %v631_v17 = vadd.f32 %v1049_v15, %v935_v36  ;;  %1074 = vmatprep.mubr.bf16.mxu0 %v654_v13  ;;  %v646_v22 = vmax.f32 %v620_v16, 0.0 }
 0x1c6   : > { %v622_v19 = vpop.f32.mrf.mxu1  ;;  %1075 = vmatmul.mubr.bf16.gmra.mxu0 %v655_v14 }
 0x1c7   : > { %v623_v20 = vadd.f32 %v935_v36, %v622_v19  ;;  %v649_v21 = vmax.f32 %v631_v17, 0.0 }
 0x1c9   : > { %v647_v23 = vmax.f32 %v623_v20, 0.0  ;;  %v657_v26 = vpack.c.bf16 %v649_v21, %v648_v24 }
 0x1cb   : > { %v656_v25 = vpack.c.bf16 %v647_v23, %v646_v22 }
 0x1cd   : > { %1078 = vmatprep.mubr.bf16.mxu0 %v656_v25 }
 0x1ce   : > { %1079 = vmatmul.mubr.bf16.gmra.mxu0 %v657_v26 }
 0x276   : > { %v1068_v28 = vpop.f32.mrf.mxu0 }
 0x277   : > { %v772_v29 = vadd.f32 %v1068_v28, %v944_v27 }
 0x278   : > { %v763_v30 = vpop.f32.mrf.mxu0 }
 0x279   : > { %828 = vst [vmem:[%s1386_s18 + $0x10] sm:$0xff] %v772_v29  ;;  %v764_v31 = vadd.f32 %v944_v27, %v763_v30 }
 0x27a   : > { %v1069_v32 = vpop.f32.mrf.mxu0 }
 0x27b   : > { %826 = vst [vmem:[%s1386_s18] sm:$0xff] %v764_v31  ;;  %v775_v33 = vadd.f32 %v1069_v32, %v944_v27 }
 0x27c   : > { %v766_v34 = vpop.f32.mrf.mxu0 }
 0x27d   : > { %829 = vst [vmem:[%s1386_s18 + $0x18] sm:$0xff] %v775_v33  ;;  %v767_v35 = vadd.f32 %v944_v27, %v766_v34 }
 0x27e   : > { %v1072_v36 = vpop.f32.mrf.mxu0 }
 0x27f   : > { %827 = vst [vmem:[%s1386_s18 + $0x8] sm:$0xff] %v767_v35  ;;  %v788_v37 = vadd.f32 %v1072_v36, %v944_v27 }
 0x280   : > { %v779_v38 = vpop.f32.mrf.mxu0 }
 0x281   : > { %832 = vst [vmem:[%s1386_s18 + $0x30] sm:$0xff] %v788_v37  ;;  %v780_v39 = vadd.f32 %v944_v27, %v779_v38 }
 0x282   : > { %v1073_v40 = vpop.f32.mrf.mxu0 }
 0x283   : > { %830 = vst [vmem:[%s1386_s18 + $0x20] sm:$0xff] %v780_v39  ;;  %v791_v41 = vadd.f32 %v1073_v40, %v944_v27 }
 0x284   : > { %v782_v42 = vpop.f32.mrf.mxu0 }
 0x285   : > { %833 = vst [vmem:[%s1386_s18 + $0x38] sm:$0xff] %v791_v41  ;;  %v783_v43 = vadd.f32 %v944_v27, %v782_v42 }
 0x286   : > { %v1076_v44 = vpop.f32.mrf.mxu0 }
 0x287   : > { %831 = vst [vmem:[%s1386_s18 + $0x28] sm:$0xff] %v783_v43  ;;  %v804_v45 = vadd.f32 %v1076_v44, %v944_v27 }
 0x288   : > { %v795_v46 = vpop.f32.mrf.mxu0 }
 0x289   : > { %836 = vst [vmem:[%s1386_s18 + $0x50] sm:$0xff] %v804_v45  ;;  %v796_v47 = vadd.f32 %v944_v27, %v795_v46 }
 0x28a   : > { %v1077_v48 = vpop.f32.mrf.mxu0 }
 0x28b   : > { %834 = vst [vmem:[%s1386_s18 + $0x40] sm:$0xff] %v796_v47  ;;  %v807_v49 = vadd.f32 %v1077_v48, %v944_v27 }
 0x28c   : > { %v798_v50 = vpop.f32.mrf.mxu0 }
 0x28d   : > { %837 = vst [vmem:[%s1386_s18 + $0x58] sm:$0xff] %v807_v49  ;;  %v799_v51 = vadd.f32 %v944_v27, %v798_v50 }
 0x28e   : > { %v1080_v52 = vpop.f32.mrf.mxu0 }
 0x28f   : > { %835 = vst [vmem:[%s1386_s18 + $0x48] sm:$0xff] %v799_v51  ;;  %v820_v53 = vadd.f32 %v1080_v52, %v944_v27 }
 0x290   : > { %v811_v54 = vpop.f32.mrf.mxu0 }
 0x291   : > { %840 = vst [vmem:[%s1386_s18 + $0x70] sm:$0xff] %v820_v53  ;;  %v812_v55 = vadd.f32 %v944_v27, %v811_v54 }
 0x292   : > { %v1081_v56 = vpop.f32.mrf.mxu0 }
 0x293   : > { %838 = vst [vmem:[%s1386_s18 + $0x60] sm:$0xff] %v812_v55  ;;  %v823_v57 = vadd.f32 %v1081_v56, %v944_v27 }
 0x294   : > { %v814_v58 = vpop.f32.mrf.mxu0 }
 0x295   : > { %841 = vst [vmem:[%s1386_s18 + $0x78] sm:$0xff] %v823_v57  ;;  %v815_v59 = vadd.f32 %v944_v27, %v814_v58 }
 0x297   : > { %839 = vst [vmem:[%s1386_s18 + $0x68] sm:$0xff] %v815_v59 }
 0x298   : > { %1153 = shalt.err (!%p1150_p3)
}
 0x299   : > { %s1154_s14 = scalar_lea.hbm %s1407_s23, 2048  ;;  %s1158_s17 = scalar_lea.hbm %s1462_s7, 4096 }
 0x29a   : > { %p1155_p4 = scmp.ne.s32.totalorder %s1407_s23, %s1154_s14  ;;  %p1159_p9 = scmp.lt.s32.totalorder %s1407_s23, %s1462_s7 }
 0x29b   : > { %p1160_p10 = scmp.lt.s32.totalorder %s1158_s17, %s1154_s14 }
 0x29c   : > { %p1156_p7 = pnand %p1155_p4, %p1283_p5 }
 0x29d   : > { %p1161_p11 = por %p1160_p10, %p1159_p9 }
 0x29e   : > { %p1157_p8 = pneg %p1156_p7 }
 0x2a0   : > { %p1162_p12 = pnand %p1161_p11, %p1157_p8 }
 0x2a2   : > { %1165 = shalt.err (!%p1162_p12)
}
 0x2a3   : > { %s1203_s21 = smov 128   ;;  %s1204_s22 = smov 8  }
 0x2a4   : > { %1082 = dma.vmem_to_hbm [thread:$0]  (%p1283_p5), %s1409_s20, 2048, %s1407_s23, %s1415_s28, %s1203_s21, %s1203_s21, %s1204_s22  }
 0x2a5 PF: > { %p1088_p13 = scmp.ge.s32.totalorder %s1200_s27, 2  ;;  %s871_s29 = sand.u32 1, %s1188_s24  }
 0x2a6   : > { %s872_s8 = scalar_lea.sflag [#allocation3], %s871_s29 }
 0x2a7   : > { %p1085_p0 = pnand %p1088_p13, %p1287_p6 }
 0x2a9   : > { %p1086_p1 = pneg %p1085_p0 }
 0x2ab   : > { %1183 = dma.done.wait (%p1086_p1), %s872_s8, 2048  }
 0x2ac   : > { %1185 = vsyncadd (%p1086_p1), %s872_s8, 4294965248  ;;  %p17_p2 = scmp.ge.s32.totalorder %s1270_s30, 4   ;;  %s1465_s24 = smov %s1192_s25 }
 0x2ad   : > { %s1466_s25 = smov %s1196_s26  ;;  %s1467_s26 = smov %s1281_s10 }
 0x2ae   : > { %s1468_s27 = smov %s1270_s30  ;;  %19 = sbr.rel (!%p17_p2) target bundleno = 3 (0x3), region = 83 }
 0x2b3   :  { %877 = vsyncpa [#allocation3], 1 }
 0x2b4   :  { %879 = vsyncpa [#allocation3 + $0x1], 1 }

</bundles_post_ra>
